<compile_context>
chip_gen: v7x
topology: tpu7x:2x2x1
jax: 0.10.0
libtpu: 0.0.40
codegen_flags: <defaults>
</compile_context>

<pallas_src>
import functools

import jax
import jax.numpy as jnp
from jax.experimental import pallas as pl
from jax.experimental.pallas import tpu as pltpu

LANE = 128
SUBLANE_BF16 = 16


def _round_up(x, m):
    return ((x + m - 1) // m) * m


def domain_discriminator_kernel(x_ref,
                                w1_ref, b1_ref,
                                w2_ref, b2_ref,
                                w3_ref, b3_ref,
                                w4_ref, b4_ref,
                                o_ref):
    # Layer 1: Linear(input_dim -> hidden) + ReLU
    # bf16 operands, f32 accumulation; bias-add/ReLU in f32.
    h = jnp.dot(x_ref[...], w1_ref[...], preferred_element_type=jnp.float32)
    h = jnp.maximum(h + b1_ref[...], 0.0)
    # Layer 2: Linear(hidden -> hidden // 2) + ReLU
    h = jnp.dot(h.astype(jnp.bfloat16), w2_ref[...],
                preferred_element_type=jnp.float32)
    h = jnp.maximum(h + b2_ref[...], 0.0)
    # Layer 3: Linear(hidden // 2 -> hidden // 4) + ReLU
    h = jnp.dot(h.astype(jnp.bfloat16), w3_ref[...],
                preferred_element_type=jnp.float32)
    h = jnp.maximum(h + b3_ref[...], 0.0)
    # Layer 4: Linear(hidden // 4 -> 2), padded to 128 lanes (lane-dense
    # store; wrapper slices [:, :2]). Padded columns are exactly zero+bias=0.
    h = jnp.dot(h.astype(jnp.bfloat16), w4_ref[...],
                preferred_element_type=jnp.float32)
    o_ref[...] = (h + b4_ref[...]).astype(o_ref.dtype)


def _pad_params(params):
    """Zero-pad every layer's output width to a multiple of 128 lanes and the
    next layer's input rows to match. Padding is exact: padded activation
    columns are 0 (zero weight cols + zero bias, ReLU(0)=0) and padded weight
    rows multiply those zeros, so results are unchanged."""
    padded = {}
    prev_out_pad = None
    for i in range(1, 5):
        w = params[f"w{i}"]
        b = params[f"b{i}"]
        k, n = w.shape
        k_pad = k if prev_out_pad is None else prev_out_pad
        n_pad = _round_up(n, LANE)
        w_p = jnp.zeros((k_pad, n_pad), jnp.float32).at[:k, :n].set(w)
        b_p = jnp.zeros((1, n_pad), jnp.float32).at[:, :n].set(b)
        padded[f"w{i}"] = w_p.astype(jnp.bfloat16)   # bf16 matmul operands
        padded[f"b{i}"] = b_p                        # biases stay f32
        prev_out_pad = n_pad
    return padded


@functools.partial(jax.jit, static_argnames=("tb",))
def domain_discriminator_forward(x, params, tb=256):
    """x: (batch, input_dim) f32; params: w1..w4 (in,out), b1..b4 (1,out)."""
    batch, d = x.shape
    out_dim = params["w4"].shape[1]  # = 2

    pp = _pad_params(params)
    p4 = pp["w4"].shape[1]           # padded logit width (128)

    # Batch tile: multiple of 16 (bf16 sublane packing), capped by VMEM budget.
    tb = min(tb, _round_up(batch, SUBLANE_BF16))
    padded_batch = _round_up(batch, tb)
    x_p = jnp.zeros((padded_batch, d), jnp.bfloat16).at[:batch].set(
        x.astype(jnp.bfloat16))

    grid = (padded_batch // tb,)
    x_spec = pl.BlockSpec((tb, d), lambda i: (i, 0))
    out_spec = pl.BlockSpec((tb, p4), lambda i: (i, 0))

    def resident(arr):
        return pl.BlockSpec(arr.shape, lambda i: (0, 0))

    args = (x_p,
            pp["w1"], pp["b1"], pp["w2"], pp["b2"],
            pp["w3"], pp["b3"], pp["w4"], pp["b4"])
    in_specs = [x_spec] + [resident(a) for a in args[1:]]

    # Cost estimate (real, unpadded math) so XLA can schedule around the call.
    dims = [d] + [params[f"w{i}"].shape[1] for i in range(1, 5)]
    flops = 2 * batch * sum(dims[i] * dims[i + 1] for i in range(4))
    bytes_accessed = (x_p.size * 2
                      + sum(pp[f"w{i}"].size * 2 + pp[f"b{i}"].size * 4
                            for i in range(1, 5))
                      + padded_batch * p4 * 4)
    cost = pl.CostEstimate(flops=flops, transcendentals=0,
                           bytes_accessed=bytes_accessed)

    # VMEM budget: resident weights/biases + double-buffered x (bf16) and
    # out (f32) tiles + headroom for intermediates. Capped at 64 MiB (v7x).
    w_bytes = sum(pp[f"w{i}"].size * 2 + pp[f"b{i}"].size * 4
                  for i in range(1, 5))
    io_bytes = 2 * tb * d * 2 + 2 * tb * p4 * 4
    vmem_limit = int(min(max(w_bytes + io_bytes + (8 << 20), 16 << 20),
                         64 << 20))

    out = pl.pallas_call(
        domain_discriminator_kernel,
        out_shape=jax.ShapeDtypeStruct((padded_batch, p4), jnp.float32),
        grid=grid,
        in_specs=in_specs,
        out_specs=out_spec,
        compiler_params=pltpu.CompilerParams(
            dimension_semantics=("parallel",),
            vmem_limit_bytes=vmem_limit),
        cost_estimate=cost,
    )(*args)
    return out[:batch, :out_dim]


def init_params(key, input_dim, hidden_dim):
    """PyTorch-style nn.Linear init: U(-1/sqrt(fan_in), 1/sqrt(fan_in))."""
    dims = [input_dim, hidden_dim, hidden_dim // 2, hidden_dim // 4, 2]
    params = {}
    for i in range(4):
        fan_in, fan_out = dims[i], dims[i + 1]
        key, kw, kb = jax.random.split(key, 3)
        bound = 1.0 / (fan_in ** 0.5)
        params[f"w{i+1}"] = jax.random.uniform(
            kw, (fan_in, fan_out), jnp.float32, minval=-bound, maxval=bound)
        params[f"b{i+1}"] = jax.random.uniform(
            kb, (1, fan_out), jnp.float32, minval=-bound, maxval=bound)
    return params


def reference_forward(x, params):
    """bf16-operand / f32-accumulation reference matching kernel numerics."""
    h = x
    for i in range(1, 5):
        w = params[f"w{i}"].astype(jnp.bfloat16)
        hh = jax.lax.dot(h.astype(jnp.bfloat16), w,
                         preferred_element_type=jnp.float32)
        hh = hh + params[f"b{i}"]
        h = jnp.maximum(hh, 0.0) if i < 4 else hh
    return h


if __name__ == "__main__":
    # Small shapes consistent with the module structure (4-layer MLP head).
    batch = 8
    input_dim = 128
    hidden_dim = 64

    key = jax.random.PRNGKey(0)
    key, kx = jax.random.split(key)
    x = jax.random.normal(kx, (batch, input_dim), jnp.float32)
    params = init_params(key, input_dim, hidden_dim)

    out = domain_discriminator_forward(x, params)
    out = jax.block_until_ready(out)

    ref = reference_forward(x, params)
    assert out.shape == (batch, 2), out.shape
    assert jnp.allclose(out, ref, atol=2e-2, rtol=2e-2), "mismatch vs reference"

    print("KERNEL_OK")
</pallas_src>

<mosaic_0001>
module attributes {stable_mosaic.version = 11 : i64} {
  func.func @domain_discriminator_kernel(%arg0: i32, %arg1: memref<16x128xbf16, #tpu.memory_space<vmem>>, %arg2: memref<128x128xbf16, #tpu.memory_space<vmem>>, %arg3: memref<1x128xf32, #tpu.memory_space<vmem>>, %arg4: memref<128x128xbf16, #tpu.memory_space<vmem>>, %arg5: memref<1x128xf32, #tpu.memory_space<vmem>>, %arg6: memref<128x128xbf16, #tpu.memory_space<vmem>>, %arg7: memref<1x128xf32, #tpu.memory_space<vmem>>, %arg8: memref<128x128xbf16, #tpu.memory_space<vmem>>, %arg9: memref<1x128xf32, #tpu.memory_space<vmem>>, %arg10: memref<16x128xf32, #tpu.memory_space<vmem>>) attributes {dimension_semantics = [#tpu.dimension_semantics<parallel>], iteration_bounds = array<i64: 1>, scalar_prefetch = 0 : i64, scratch_operands = 0 : i64, tpu.core_type = #tpu.core_type<tc>, window_params = [{transform_indices = @transform_0, window_bounds = array<i64: 16, 128>}, {pipeline_mode = #tpu.pipeline_mode<synchronous>, transform_indices = @transform_1, window_bounds = array<i64: 128, 128>}, {pipeline_mode = #tpu.pipeline_mode<synchronous>, transform_indices = @transform_2, window_bounds = array<i64: 1, 128>}, {pipeline_mode = #tpu.pipeline_mode<synchronous>, transform_indices = @transform_3, window_bounds = array<i64: 128, 128>}, {pipeline_mode = #tpu.pipeline_mode<synchronous>, transform_indices = @transform_4, window_bounds = array<i64: 1, 128>}, {pipeline_mode = #tpu.pipeline_mode<synchronous>, transform_indices = @transform_5, window_bounds = array<i64: 128, 128>}, {pipeline_mode = #tpu.pipeline_mode<synchronous>, transform_indices = @transform_6, window_bounds = array<i64: 1, 128>}, {pipeline_mode = #tpu.pipeline_mode<synchronous>, transform_indices = @transform_7, window_bounds = array<i64: 128, 128>}, {pipeline_mode = #tpu.pipeline_mode<synchronous>, transform_indices = @transform_8, window_bounds = array<i64: 1, 128>}, {transform_indices = @transform_9, window_bounds = array<i64: 16, 128>}]} {
    %c0 = arith.constant 0 : index
    %c0_0 = arith.constant 0 : index
    %0 = vector.load %arg1[%c0, %c0_0] : memref<16x128xbf16, #tpu.memory_space<vmem>>, vector<16x128xbf16>
    %c0_1 = arith.constant 0 : index
    %c0_2 = arith.constant 0 : index
    %1 = vector.load %arg2[%c0_1, %c0_2] : memref<128x128xbf16, #tpu.memory_space<vmem>>, vector<128x128xbf16>
    %cst = arith.constant dense<0.000000e+00> : vector<16x128xf32>
    %2 = tpu.matmul %0, %1, %cst {dimension_numbers = #tpu.dot_dimension_numbers<[1], [0], [0], [1], [0, 0, 1, 1], [], []>} : vector<16x128xbf16>, vector<128x128xbf16>, vector<16x128xf32> -> vector<16x128xf32>
    %c0_3 = arith.constant 0 : index
    %c0_4 = arith.constant 0 : index
    %3 = vector.load %arg3[%c0_3, %c0_4] : memref<1x128xf32, #tpu.memory_space<vmem>>, vector<1x128xf32>
    %4 = vector.broadcast %3 : vector<1x128xf32> to vector<16x128xf32>
    %5 = arith.addf %2, %4 : vector<16x128xf32>
    %cst_5 = arith.constant 0.000000e+00 : f32
    %6 = vector.broadcast %cst_5 : f32 to vector<16x128xf32>
    %7 = arith.maximumf %5, %6 : vector<16x128xf32>
    %8 = arith.truncf %7 : vector<16x128xf32> to vector<16x128xbf16>
    %c0_6 = arith.constant 0 : index
    %c0_7 = arith.constant 0 : index
    %9 = vector.load %arg4[%c0_6, %c0_7] : memref<128x128xbf16, #tpu.memory_space<vmem>>, vector<128x128xbf16>
    %cst_8 = arith.constant dense<0.000000e+00> : vector<16x128xf32>
    %10 = tpu.matmul %8, %9, %cst_8 {dimension_numbers = #tpu.dot_dimension_numbers<[1], [0], [0], [1], [0, 0, 1, 1], [], []>} : vector<16x128xbf16>, vector<128x128xbf16>, vector<16x128xf32> -> vector<16x128xf32>
    %c0_9 = arith.constant 0 : index
    %c0_10 = arith.constant 0 : index
    %11 = vector.load %arg5[%c0_9, %c0_10] : memref<1x128xf32, #tpu.memory_space<vmem>>, vector<1x128xf32>
    %12 = vector.broadcast %11 : vector<1x128xf32> to vector<16x128xf32>
    %13 = arith.addf %10, %12 : vector<16x128xf32>
    %cst_11 = arith.constant 0.000000e+00 : f32
    %14 = vector.broadcast %cst_11 : f32 to vector<16x128xf32>
    %15 = arith.maximumf %13, %14 : vector<16x128xf32>
    %16 = arith.truncf %15 : vector<16x128xf32> to vector<16x128xbf16>
    %c0_12 = arith.constant 0 : index
    %c0_13 = arith.constant 0 : index
    %17 = vector.load %arg6[%c0_12, %c0_13] : memref<128x128xbf16, #tpu.memory_space<vmem>>, vector<128x128xbf16>
    %cst_14 = arith.constant dense<0.000000e+00> : vector<16x128xf32>
    %18 = tpu.matmul %16, %17, %cst_14 {dimension_numbers = #tpu.dot_dimension_numbers<[1], [0], [0], [1], [0, 0, 1, 1], [], []>} : vector<16x128xbf16>, vector<128x128xbf16>, vector<16x128xf32> -> vector<16x128xf32>
    %c0_15 = arith.constant 0 : index
    %c0_16 = arith.constant 0 : index
    %19 = vector.load %arg7[%c0_15, %c0_16] : memref<1x128xf32, #tpu.memory_space<vmem>>, vector<1x128xf32>
    %20 = vector.broadcast %19 : vector<1x128xf32> to vector<16x128xf32>
    %21 = arith.addf %18, %20 : vector<16x128xf32>
    %cst_17 = arith.constant 0.000000e+00 : f32
    %22 = vector.broadcast %cst_17 : f32 to vector<16x128xf32>
    %23 = arith.maximumf %21, %22 : vector<16x128xf32>
    %24 = arith.truncf %23 : vector<16x128xf32> to vector<16x128xbf16>
    %c0_18 = arith.constant 0 : index
    %c0_19 = arith.constant 0 : index
    %25 = vector.load %arg8[%c0_18, %c0_19] : memref<128x128xbf16, #tpu.memory_space<vmem>>, vector<128x128xbf16>
    %cst_20 = arith.constant dense<0.000000e+00> : vector<16x128xf32>
    %26 = tpu.matmul %24, %25, %cst_20 {dimension_numbers = #tpu.dot_dimension_numbers<[1], [0], [0], [1], [0, 0, 1, 1], [], []>} : vector<16x128xbf16>, vector<128x128xbf16>, vector<16x128xf32> -> vector<16x128xf32>
    %c0_21 = arith.constant 0 : index
    %c0_22 = arith.constant 0 : index
    %27 = vector.load %arg9[%c0_21, %c0_22] : memref<1x128xf32, #tpu.memory_space<vmem>>, vector<1x128xf32>
    %28 = vector.broadcast %27 : vector<1x128xf32> to vector<16x128xf32>
    %29 = arith.addf %26, %28 : vector<16x128xf32>
    %c0_23 = arith.constant 0 : index
    %c0_24 = arith.constant 0 : index
    %30 = vector.load %arg10[%c0_23, %c0_24] : memref<16x128xf32, #tpu.memory_space<vmem>>, vector<16x128xf32>
    tpu.vector_store %arg10[%c0_23, %c0_24], %29 {strides = array<i32>} : memref<16x128xf32, #tpu.memory_space<vmem>>, vector<16x128xf32>,
    return
  }
  func.func @transform_0(%arg0: i32) -> (i32, i32) {
    %c0_i32 = arith.constant 0 : i32
    %c0_i32_0 = arith.constant 0 : i32
    return %arg0, %c0_i32 : i32, i32
  }
  func.func @transform_1(%arg0: i32) -> (i32, i32) {
    %c0_i32 = arith.constant 0 : i32
    %c0_i32_0 = arith.constant 0 : i32
    %c0_i32_1 = arith.constant 0 : i32
    return %c0_i32, %c0_i32_0 : i32, i32
  }
  func.func @transform_2(%arg0: i32) -> (i32, i32) {
    %c0_i32 = arith.constant 0 : i32
    %c0_i32_0 = arith.constant 0 : i32
    %c0_i32_1 = arith.constant 0 : i32
    return %c0_i32, %c0_i32_0 : i32, i32
  }
  func.func @transform_3(%arg0: i32) -> (i32, i32) {
    %c0_i32 = arith.constant 0 : i32
    %c0_i32_0 = arith.constant 0 : i32
    %c0_i32_1 = arith.constant 0 : i32
    return %c0_i32, %c0_i32_0 : i32, i32
  }
  func.func @transform_4(%arg0: i32) -> (i32, i32) {
    %c0_i32 = arith.constant 0 : i32
    %c0_i32_0 = arith.constant 0 : i32
    %c0_i32_1 = arith.constant 0 : i32
    return %c0_i32, %c0_i32_0 : i32, i32
  }
  func.func @transform_5(%arg0: i32) -> (i32, i32) {
    %c0_i32 = arith.constant 0 : i32
    %c0_i32_0 = arith.constant 0 : i32
    %c0_i32_1 = arith.constant 0 : i32
    return %c0_i32, %c0_i32_0 : i32, i32
  }
  func.func @transform_6(%arg0: i32) -> (i32, i32) {
    %c0_i32 = arith.constant 0 : i32
    %c0_i32_0 = arith.constant 0 : i32
    %c0_i32_1 = arith.constant 0 : i32
    return %c0_i32, %c0_i32_0 : i32, i32
  }
  func.func @transform_7(%arg0: i32) -> (i32, i32) {
    %c0_i32 = arith.constant 0 : i32
    %c0_i32_0 = arith.constant 0 : i32
    %c0_i32_1 = arith.constant 0 : i32
    return %c0_i32, %c0_i32_0 : i32, i32
  }
  func.func @transform_8(%arg0: i32) -> (i32, i32) {
    %c0_i32 = arith.constant 0 : i32
    %c0_i32_0 = arith.constant 0 : i32
    %c0_i32_1 = arith.constant 0 : i32
    return %c0_i32, %c0_i32_0 : i32, i32
  }
  func.func @transform_9(%arg0: i32) -> (i32, i32) {
    %c0_i32 = arith.constant 0 : i32
    %c0_i32_0 = arith.constant 0 : i32
    return %arg0, %c0_i32 : i32, i32
  }
}

</mosaic_0001>

<bundles_post_ra>
// kernel: domain_discriminator_forward.1
= control target key start
LH: loop header
LB: loop body
LE: loop exit
PB: predicated region body
PF: predicated region fallthrough
CT: control target
= control target key end

     0   :  { %v692_v0 = vmov 0.0   ;;  %vm693_vm0 = vmmov 0   ;;  %s901_s1 = inlined_call_operand.vmem [shape: bf16[128,128], index: 1, kind: input, shape index: {}]   ;;  %s902_s3 = inlined_call_operand.vmem [shape: bf16[128,128], index: 3, kind: input, shape index: {}]   ;;  %s903_s0 = inlined_call_operand.vmem [shape: bf16[16,128], index: 0, kind: input, shape index: {}]   ;;  %s904_s5 = inlined_call_operand.vmem [shape: bf16[128,128], index: 5, kind: input, shape index: {}]   ;;  %s905_s2 = inlined_call_operand.vmem [shape: f32[1,128], index: 2, kind: input, shape index: {}]   ;;  %s906_s7 = inlined_call_operand.vmem [shape: bf16[128,128], index: 7, kind: input, shape index: {}]   ;;  %s907_s4 = inlined_call_operand.vmem [shape: f32[1,128], index: 4, kind: input, shape index: {}]   ;;  %s908_s6 = inlined_call_operand.vmem [shape: f32[1,128], index: 6, kind: input, shape index: {}]   ;;  %s909_s8 = inlined_call_operand.vmem [shape: f32[1,128], index: 8, kind: input, shape index: {}]   ;;  %s910_s9 = inlined_call_operand.vmem [shape: f32[16,128], index: 9, kind: output, shape index: {}]  }
   0x1   :  { %577 = vmatprep.subr.bf16.mxu0 %v692_v0  ;;  %v659_v1 = vld [vmem:[%s901_s1] sm:$0xff]   ;;  %593 = vmatprep.mubr.msk.bf16.mxu0 %vm693_vm0, %v692_v0  ;;  %v660_v2 = vld [vmem:[%s901_s1 + $0x8] sm:$0xff]   ;;  %v661_v3 = vld [vmem:[%s901_s1 + $0x10] sm:$0xff]  }
   0x2   :  { %597 = vmatprep.subr.bf16.mxu1 %v692_v0  ;;  %613 = vmatprep.mubr.msk.bf16.mxu1 %vm693_vm0, %v692_v0  ;;  %v668_v4 = vld [vmem:[%s902_s3] sm:$0xff]   ;;  %v662_v5 = vld [vmem:[%s901_s1 + $0x18] sm:$0xff]   ;;  %v669_v6 = vld [vmem:[%s902_s3 + $0x8] sm:$0xff]  }
   0x3   :  { %578 = vmatpush3.bf16.msra.mxu0 %v659_v1  ;;  %598 = vmatpush3.bf16.msra.mxu1 %v668_v4  ;;  %v663_v7 = vld [vmem:[%s901_s1 + $0x20] sm:$0xff]   ;;  %v670_v8 = vld [vmem:[%s902_s3 + $0x10] sm:$0xff]   ;;  %v664_v9 = vld [vmem:[%s901_s1 + $0x28] sm:$0xff]  }
   0x4   :  { %579 = vmatprep.subr.bf16.mxu0 %v692_v0  ;;  %599 = vmatprep.subr.bf16.mxu1 %v692_v0  ;;  %v671_v10 = vld [vmem:[%s902_s3 + $0x18] sm:$0xff]   ;;  %v665_v11 = vld [vmem:[%s901_s1 + $0x30] sm:$0xff]   ;;  %v672_v12 = vld [vmem:[%s902_s3 + $0x20] sm:$0xff]  }
   0x5   :  { %v666_v13 = vld [vmem:[%s901_s1 + $0x38] sm:$0xff]   ;;  %v673_v14 = vld [vmem:[%s902_s3 + $0x28] sm:$0xff]   ;;  %v667_v15 = vld [vmem:[%s903_s0] sm:$0xff]  }
   0x6   :  { %v674_v16 = vld [vmem:[%s902_s3 + $0x30] sm:$0xff]   ;;  %v675_v17 = vld [vmem:[%s902_s3 + $0x38] sm:$0xff]   ;;  %v676_v18 = vld [vmem:[%s904_s5] sm:$0xff]  }
   0x7   :  { %580 = vmatpush3.bf16.msra.mxu0 %v660_v2  ;;  %600 = vmatpush3.bf16.msra.mxu1 %v669_v6  ;;  %v677_v19 = vld [vmem:[%s904_s5 + $0x8] sm:$0xff]   ;;  %v678_v20 = vld [vmem:[%s904_s5 + $0x10] sm:$0xff]   ;;  %v679_v21 = vld [vmem:[%s904_s5 + $0x18] sm:$0xff]  }
   0x8   :  { %581 = vmatprep.subr.bf16.mxu0 %v692_v0  ;;  %601 = vmatprep.subr.bf16.mxu1 %v692_v0  ;;  %v680_v22 = vld [vmem:[%s904_s5 + $0x20] sm:$0xff]   ;;  %v681_v23 = vld [vmem:[%s904_s5 + $0x28] sm:$0xff]   ;;  %v682_v34 = vld [vmem:[%s904_s5 + $0x30] sm:$0xff]  }
   0x9   :  { %v504_v24 = vld [vmem:[%s905_s2] ss:$0 sm:$0xff]  ;;  %v683_v35 = vld [vmem:[%s904_s5 + $0x38] sm:$0xff]   ;;  %v685_v37 = vld [vmem:[%s906_s7 + $0x8] sm:$0xff]  }
   0xa   :  { %v684_v36 = vld [vmem:[%s906_s7] sm:$0xff]   ;;  %v686_v38 = vld [vmem:[%s906_s7 + $0x10] sm:$0xff]   ;;  %v687_v39 = vld [vmem:[%s906_s7 + $0x18] sm:$0xff]  }
   0xb   :  { %582 = vmatpush3.bf16.msra.mxu0 %v661_v3  ;;  %602 = vmatpush3.bf16.msra.mxu1 %v670_v8  ;;  %v688_v40 = vld [vmem:[%s906_s7 + $0x20] sm:$0xff]   ;;  %v689_v41 = vld [vmem:[%s906_s7 + $0x28] sm:$0xff]   ;;  %v690_v52 = vld [vmem:[%s906_s7 + $0x30] sm:$0xff]  }
   0xc   :  { %583 = vmatprep.subr.bf16.mxu0 %v692_v0  ;;  %603 = vmatprep.subr.bf16.mxu1 %v692_v0  ;;  %v514_v42 = vld [vmem:[%s907_s4] ss:$0 sm:$0xff]  ;;  %v691_v53 = vld [vmem:[%s906_s7 + $0x38] sm:$0xff]  }
   0xd   :  { %v523_v54 = vld [vmem:[%s908_s6] ss:$0 sm:$0xff] }
   0xf   :  { %584 = vmatpush3.bf16.msra.mxu0 %v662_v5  ;;  %604 = vmatpush3.bf16.msra.mxu1 %v671_v10 }
  0x10   :  { %585 = vmatprep.subr.bf16.mxu0 %v692_v0  ;;  %605 = vmatprep.subr.bf16.mxu1 %v692_v0 }
  0x13   :  { %586 = vmatpush3.bf16.msra.mxu0 %v663_v7  ;;  %606 = vmatpush3.bf16.msra.mxu1 %v672_v12 }
  0x14   :  { %587 = vmatprep.subr.bf16.mxu0 %v692_v0  ;;  %607 = vmatprep.subr.bf16.mxu1 %v692_v0 }
  0x17   :  { %588 = vmatpush3.bf16.msra.mxu0 %v664_v9  ;;  %608 = vmatpush3.bf16.msra.mxu1 %v673_v14 }
  0x18   :  { %589 = vmatprep.subr.bf16.mxu0 %v692_v0  ;;  %609 = vmatprep.subr.bf16.mxu1 %v692_v0 }
  0x1b   :  { %590 = vmatpush3.bf16.msra.mxu0 %v665_v11  ;;  %610 = vmatpush3.bf16.msra.mxu1 %v674_v16 }
  0x1c   :  { %591 = vmatprep.subr.bf16.mxu0 %v692_v0  ;;  %611 = vmatprep.subr.bf16.mxu1 %v692_v0 }
  0x1f   :  { %592 = vmatpush3.bf16.msra.mxu0 %v666_v13  ;;  %612 = vmatpush3.bf16.msra.mxu1 %v675_v17 }
  0x20   :  { %617 = vmatprep.subr.bf16.mxu0 %v692_v0  ;;  %637 = vmatprep.subr.bf16.mxu1 %v692_v0 }
  0x22   :  { %594 = vmatmul.mubr.bf16.vlgmr.msra.gmra.mrb[0].mxu0 %v667_v15 }
  0x23   :  { %633 = vmatprep.mubr.msk.bf16.mxu0 %vm693_vm0, %v692_v0  ;;  %618 = vmatpush3.bf16.msra.mxu0 %v676_v18 }
  0x24   :  { %619 = vmatprep.subr.bf16.mxu0 %v692_v0 }
  0x27   :  { %620 = vmatpush3.bf16.msra.mxu0 %v677_v19 }
  0x28   :  { %621 = vmatprep.subr.bf16.mxu0 %v692_v0 }
  0x2b   :  { %622 = vmatpush3.bf16.msra.mxu0 %v678_v20 }
  0x2c   :  { %623 = vmatprep.subr.bf16.mxu0 %v692_v0 }
  0x2f   :  { %624 = vmatpush3.bf16.msra.mxu0 %v679_v21 }
  0x30   :  { %625 = vmatprep.subr.bf16.mxu0 %v692_v0 }
  0x33   :  { %626 = vmatpush3.bf16.msra.mxu0 %v680_v22 }
  0x34   :  { %627 = vmatprep.subr.bf16.mxu0 %v692_v0 }
  0x37   :  { %628 = vmatpush3.bf16.msra.mxu0 %v681_v23 }
  0x38   :  { %629 = vmatprep.subr.bf16.mxu0 %v692_v0 }
  0x3b   :  { %630 = vmatpush3.bf16.msra.mxu0 %v682_v34 }
  0x3c   :  { %631 = vmatprep.subr.bf16.mxu0 %v692_v0 }
  0x3f   :  { %632 = vmatpush3.bf16.msra.mxu0 %v683_v35 }
  0xf5   :  { %v146_v25 = vpop.f32.mrb[0].mxu0 }
  0xf6   :  { %v147_v26 = vadd.f32 %v504_v24, %v146_v25  ;;  %v595_v27 = vpop.f32.mrb[1].mxu0 }
  0xf7   :  { %v149_v28 = vpop.f32.mrb[2].mxu0 }
  0xf8   :  { %v150_v29 = vadd.f32 %v504_v24, %v149_v28  ;;  %v596_v30 = vpop.f32.mrb[3].mxu0  ;;  %v153_v31 = vmax.f32 %v147_v26, 0.0 }
  0xfa   :  { %v154_v32 = vmax.f32 %v150_v29, 0.0 }
  0xfc   :  { %v155_v33 = vpack.c.bf16 %v154_v32, %v153_v31 }
  0xfe   :  { %614 = vmatmul.mubr.bf16.vlgmr.msra.gmra.mrb[0].mxu1 %v155_v33 }
  0xff   :  { %653 = vmatprep.mubr.msk.bf16.mxu1 %vm693_vm0, %v692_v0  ;;  %638 = vmatpush3.bf16.msra.mxu1 %v684_v36 }
 0x100   :  { %639 = vmatprep.subr.bf16.mxu1 %v692_v0 }
 0x103   :  { %640 = vmatpush3.bf16.msra.mxu1 %v685_v37 }
 0x104   :  { %641 = vmatprep.subr.bf16.mxu1 %v692_v0 }
 0x107   :  { %642 = vmatpush3.bf16.msra.mxu1 %v686_v38 }
 0x108   :  { %643 = vmatprep.subr.bf16.mxu1 %v692_v0 }
 0x10b   :  { %644 = vmatpush3.bf16.msra.mxu1 %v687_v39 }
 0x10c   :  { %645 = vmatprep.subr.bf16.mxu1 %v692_v0 }
 0x10f   :  { %646 = vmatpush3.bf16.msra.mxu1 %v688_v40 }
 0x110   :  { %647 = vmatprep.subr.bf16.mxu1 %v692_v0 }
 0x113   :  { %648 = vmatpush3.bf16.msra.mxu1 %v689_v41 }
 0x114   :  { %649 = vmatprep.subr.bf16.mxu1 %v692_v0 }
 0x117   :  { %650 = vmatpush3.bf16.msra.mxu1 %v690_v52 }
 0x118   :  { %651 = vmatprep.subr.bf16.mxu1 %v692_v0  ;;  %v532_v0 = vld [vmem:[%s909_s8] ss:$0 sm:$0xff] }
 0x11b   :  { %652 = vmatpush3.bf16.msra.mxu1 %v691_v53 }
 0x1d1   :  { %v261_v43 = vpop.f32.mrb[0].mxu1 }
 0x1d2   :  { %v262_v44 = vadd.f32 %v514_v42, %v261_v43  ;;  %v615_v45 = vpop.f32.mrb[1].mxu1 }
 0x1d3   :  { %v264_v46 = vpop.f32.mrb[2].mxu1 }
 0x1d4   :  { %v265_v47 = vadd.f32 %v514_v42, %v264_v46  ;;  %v616_v48 = vpop.f32.mrb[3].mxu1  ;;  %v268_v49 = vmax.f32 %v262_v44, 0.0 }
 0x1d6   :  { %v269_v50 = vmax.f32 %v265_v47, 0.0 }
 0x1d8   :  { %v270_v51 = vpack.c.bf16 %v269_v50, %v268_v49 }
 0x1da   :  { %634 = vmatmul.mubr.bf16.vlgmr.msra.gmra.mrb[4].mxu0 %v270_v51 }
 0x2ad   :  { %v376_v55 = vpop.f32.mrb[4].mxu0 }
 0x2ae   :  { %v377_v56 = vadd.f32 %v523_v54, %v376_v55  ;;  %v635_v57 = vpop.f32.mrb[5].mxu0 }
 0x2af   :  { %v379_v58 = vpop.f32.mrb[6].mxu0 }
 0x2b0   :  { %v380_v59 = vadd.f32 %v523_v54, %v379_v58  ;;  %v636_v60 = vpop.f32.mrb[7].mxu0  ;;  %v383_v61 = vmax.f32 %v377_v56, 0.0 }
 0x2b2   :  { %v384_v62 = vmax.f32 %v380_v59, 0.0 }
 0x2b4   :  { %v385_v63 = vpack.c.bf16 %v384_v62, %v383_v61 }
 0x2b6   :  { %654 = vmatmul.mubr.bf16.vlgmr.msra.gmra.mrb[4].mxu1 %v385_v63 }
 0x389   :  { %v491_v1 = vpop.f32.mrb[4].mxu1 }
 0x38a   :  { %v492_v2 = vadd.f32 %v532_v0, %v491_v1  ;;  %v655_v3 = vpop.f32.mrb[5].mxu1 }
 0x38b   :  { %v494_v4 = vpop.f32.mrb[6].mxu1 }
 0x38c   :  { %498 = vst [vmem:[%s910_s9] sm:$0xff] %v492_v2  ;;  %v495_v5 = vadd.f32 %v532_v0, %v494_v4  ;;  %v656_v6 = vpop.f32.mrb[7].mxu1 }
 0x38e   :  { %499 = vst [vmem:[%s910_s9 + $0x8] sm:$0xff] %v495_v5 }

</bundles_post_ra>
